<compile_context>
chip_gen: v7x
topology: tpu7x:2x2x1
jax: 0.10.0
libtpu: 0.0.40
codegen_flags: <defaults>
</compile_context>

<pallas_src>
import math
import functools

import jax
import jax.numpy as jnp
from jax.experimental import pallas as pl
from jax.experimental.pallas import tpu as pltpu


def _round_up(x, m):
    return ((x + m - 1) // m) * m


# ---------------------------------------------------------------------------
# Parameter construction (plain JAX glue, mirrors the PyTorch __init__)
# ---------------------------------------------------------------------------
def random_ortho(key, n, m):
    q, _ = jnp.linalg.qr(jax.random.normal(key, (n, m), dtype=jnp.float32))
    return q


def make_rff_params(key, in_dim, num_random_features, lengthscale=None):
    if lengthscale is None:
        lengthscale = math.sqrt(num_random_features / 2)

    k_w, k_norm, k_b = jax.random.split(key, 3)

    if num_random_features <= in_dim:
        W = random_ortho(k_w, in_dim, num_random_features)
    else:
        dim_left = num_random_features
        ws = []
        sub = k_w
        while dim_left > in_dim:
            sub, use = jax.random.split(sub)
            ws.append(random_ortho(use, in_dim, in_dim))
            dim_left -= in_dim
        sub, use = jax.random.split(sub)
        ws.append(random_ortho(use, in_dim, dim_left))
        W = jnp.concatenate(ws, axis=1)

    feature_norm = jax.random.normal(k_norm, W.shape, dtype=jnp.float32) ** 2
    W = W * jnp.sqrt(feature_norm.sum(0))

    b = jax.random.uniform(
        k_b, (num_random_features,), minval=0.0, maxval=2.0 * math.pi,
        dtype=jnp.float32,
    )

    return W, b, jnp.float32(lengthscale)


# ---------------------------------------------------------------------------
# Pallas kernel: matmul (f32 accumulate) + bias + cos + scale
# ---------------------------------------------------------------------------
def rff_kernel(inv_ls_ref, x_ref, w_ref, b_ref, o_ref):
    # x_ref: (tm, K)   row tile (pipelined over the grid)
    # w_ref: (K, tn)   resident (or N-blocked) weights
    # b_ref: (1, tn)   f32 bias
    # o_ref: (tm, tn)  output tile
    acc = jnp.dot(x_ref[...], w_ref[...], preferred_element_type=jnp.float32)
    acc = acc + b_ref[...]
    o_ref[...] = (jnp.cos(acc) * inv_ls_ref[0, 0]).astype(o_ref.dtype)


@functools.partial(
    jax.jit,
    static_argnames=("tm", "tn", "resident_w", "single_buffer_w", "vmem_limit"),
)
def _rff_pallas(inv_ls, x, W, b2d, *, tm, tn, resident_w, single_buffer_w,
                vmem_limit):
    M, K = x.shape
    _, N = W.shape
    io_dtype = x.dtype
    io_bytes = io_dtype.itemsize

    cost = pl.CostEstimate(
        flops=2 * M * N * K,
        transcendentals=M * N,
        bytes_accessed=(M * K * io_bytes + K * N * io_bytes
                        + N * 4 + M * N * io_bytes),
    )

    smem_spec = pl.BlockSpec(memory_space=pltpu.MemorySpace.SMEM)

    if resident_w:
        # 1-D grid over the batch; W / b fully resident (constant index_map).
        if single_buffer_w:
            w_spec = pl.BlockSpec((K, N), lambda i: (0, 0),
                                  pipeline_mode=pl.Buffered(1))
            b_spec = pl.BlockSpec((1, N), lambda i: (0, 0),
                                  pipeline_mode=pl.Buffered(1))
        else:
            w_spec = pl.BlockSpec((K, N), lambda i: (0, 0))
            b_spec = pl.BlockSpec((1, N), lambda i: (0, 0))
        grid = (pl.cdiv(M, tm),)
        in_specs = [
            smem_spec,                                    # inv_ls
            pl.BlockSpec((tm, K), lambda i: (i, 0)),      # x row tile
            w_spec,                                       # W resident
            b_spec,                                       # b resident
        ]
        out_specs = pl.BlockSpec((tm, N), lambda i: (i, 0))
        dims = ("parallel",)
    else:
        # 2-D grid: rows x feature blocks.  x block is constant across the
        # inner axis so it is fetched once per row tile.
        grid = (pl.cdiv(M, tm), pl.cdiv(N, tn))
        in_specs = [
            smem_spec,
            pl.BlockSpec((tm, K), lambda i, j: (i, 0)),
            pl.BlockSpec((K, tn), lambda i, j: (0, j)),
            pl.BlockSpec((1, tn), lambda i, j: (0, j)),
        ]
        out_specs = pl.BlockSpec((tm, tn), lambda i, j: (i, j))
        dims = ("parallel", "parallel")

    return pl.pallas_call(
        rff_kernel,
        out_shape=jax.ShapeDtypeStruct((M, N), io_dtype),
        grid_spec=pltpu.PrefetchScalarGridSpec(
            num_scalar_prefetch=0,
            grid=grid,
            in_specs=in_specs,
            out_specs=out_specs,
        ),
        compiler_params=pltpu.CompilerParams(
            dimension_semantics=dims,
            vmem_limit_bytes=vmem_limit,
        ),
        cost_estimate=cost,
    )(inv_ls, x, W, b2d)


# Cached capability flag for pl.Buffered(1) on the installed Pallas.
_SINGLE_BUFFER_WEIGHTS_OK = [True]


def rff_forward(x, W, b, lengthscale, *, tm=512, io_dtype=jnp.bfloat16):
    """cos(x @ W + b) / lengthscale via a single Pallas TPU kernel."""
    M, K = x.shape
    K2, N = W.shape
    assert K == K2, "x / W inner-dim mismatch"

    x = x.astype(io_dtype)
    W = W.astype(io_dtype)
    b2d = jnp.asarray(b, jnp.float32).reshape(1, N)
    inv_ls = (1.0 / jnp.asarray(lengthscale, jnp.float32)).reshape(1, 1)

    in_bytes = jnp.dtype(io_dtype).itemsize
    sublane = 16 if in_bytes == 2 else 8

    # --- generation-aware VMEM budget --------------------------------------
    vmem_cap = None
    try:
        vmem_cap = getattr(pltpu.get_tpu_info(), "vmem_capacity_bytes", None)
    except Exception:
        vmem_cap = None
    if not vmem_cap:
        vmem_cap = 64 << 20          # conservative: v7x per-TC VMEM
    budget = (vmem_cap * 3) // 4     # ~48 MiB on v7x, ~96 MiB on v5e/v6e

    # Can W (+ b) stay fully resident (single-buffered) within half the budget?
    resident_w = (K * N * in_bytes + N * 4) <= budget // 2

    # --- row tile selection --------------------------------------------------
    tm_eff = _round_up(max(min(tm, M), 1), sublane)
    # Guarantee >= 2 grid steps when the batch allows it, so the "parallel"
    # row axis can shard across both TensorCores on v7x.
    if M >= 2 * sublane:
        tm_eff = min(tm_eff, _round_up(pl.cdiv(M, 2), sublane))

    if resident_w:
        tn_eff = N

        def need(tile_m):
            return (2 * tile_m * K * in_bytes        # x double-buffer
                    + 2 * tile_m * N * in_bytes      # out double-buffer
                    + K * N * in_bytes               # W resident (single buf)
                    + N * 4                          # b resident (f32)
                    + 2 * tile_m * N * 4)            # f32 acc / cos intermediate

        while tm_eff > sublane and need(tm_eff) > budget:
            tm_eff = max(sublane, _round_up(tm_eff // 2, sublane))
        need_bytes = need(tm_eff)
    else:
        tn_eff = _round_up(N, 128)

        def need(tile_m, tile_n):
            return (2 * tile_m * K * in_bytes
                    + 2 * tile_m * tile_n * in_bytes
                    + 2 * K * tile_n * in_bytes      # W double-buffered over j
                    + 2 * tile_n * 4
                    + 2 * tile_m * tile_n * 4)

        while tn_eff > 128 and need(tm_eff, tn_eff) > budget:
            tn_eff = max(128, _round_up(tn_eff // 2, 128))
        while tm_eff > sublane and need(tm_eff, tn_eff) > budget:
            tm_eff = max(sublane, _round_up(tm_eff // 2, sublane))
        need_bytes = need(tm_eff, tn_eff)

    vmem_limit = int(min(max(need_bytes + (8 << 20), 32 << 20), vmem_cap))

    kwargs = dict(tm=int(tm_eff), tn=int(tn_eff), vmem_limit=vmem_limit)

    if resident_w and _SINGLE_BUFFER_WEIGHTS_OK[0]:
        try:
            out = _rff_pallas(inv_ls, x, W, b2d, resident_w=True,
                              single_buffer_w=True, **kwargs)
            return out
        except Exception:
            # Installed Pallas rejected Buffered(1); fall back permanently.
            _SINGLE_BUFFER_WEIGHTS_OK[0] = False

    return _rff_pallas(inv_ls, x, W, b2d, resident_w=resident_w,
                       single_buffer_w=False, **kwargs)


# ---------------------------------------------------------------------------
# Reference (pure JAX) for correctness check
# ---------------------------------------------------------------------------
def rff_reference(x, W, b, lengthscale):
    return jnp.cos(x @ W + b) / lengthscale


if __name__ == "__main__":
    key = jax.random.PRNGKey(0)

    # Case 1: small shapes, single tile, f32 I/O (tight tolerance).
    k_param, k_x, key = jax.random.split(key, 3)
    batch, in_dim, num_rf = 8, 16, 128
    W, b, ls = make_rff_params(k_param, in_dim, num_rf)
    x = jax.random.normal(k_x, (batch, in_dim), dtype=jnp.float32)

    out = jax.block_until_ready(rff_forward(x, W, b, ls, io_dtype=jnp.float32))
    ref = rff_reference(x, W, b, ls)
    assert out.shape == (batch, num_rf)
    assert jnp.allclose(out, ref, atol=1e-5, rtol=1e-5), "mismatch (case 1)"

    # Case 2: ragged batch (50 % tm != 0) -> masked final block, 2-step grid,
    # no pad/slice round trip.
    k_param2, k_x2, key = jax.random.split(key, 3)
    batch2, in_dim2, num_rf2 = 50, 16, 256
    W2, b2, ls2 = make_rff_params(k_param2, in_dim2, num_rf2)
    x2 = jax.random.normal(k_x2, (batch2, in_dim2), dtype=jnp.float32)

    out2 = jax.block_until_ready(rff_forward(x2, W2, b2, ls2, io_dtype=jnp.float32))
    ref2 = rff_reference(x2, W2, b2, ls2)
    assert out2.shape == (batch2, num_rf2)
    assert jnp.allclose(out2, ref2, atol=1e-5, rtol=1e-5), "mismatch (case 2)"

    # Case 3: default bf16 I/O (production path, 16-sublane tiles); compare
    # against the reference evaluated on the same bf16-rounded inputs.
    out3 = jax.block_until_ready(rff_forward(x2, W2, b2, ls2))
    ref3 = rff_reference(x2.astype(jnp.bfloat16).astype(jnp.float32),
                         W2.astype(jnp.bfloat16).astype(jnp.float32), b2, ls2)
    assert out3.shape == (batch2, num_rf2)
    assert jnp.allclose(out3.astype(jnp.float32), ref3, atol=1e-2, rtol=1e-2), \
        "mismatch (case 3, bf16)"

    print("KERNEL_OK")
</pallas_src>

<mosaic_0001>
module attributes {stable_mosaic.version = 11 : i64} {
  func.func @rff_kernel(%arg0: i32, %arg1: memref<1x1xf32, #tpu.memory_space<smem>>, %arg2: memref<8x16xf32, #tpu.memory_space<vmem>>, %arg3: memref<16x128xf32, #tpu.memory_space<vmem>>, %arg4: memref<1x128xf32, #tpu.memory_space<vmem>>, %arg5: memref<8x128xf32, #tpu.memory_space<vmem>>) attributes {dimension_semantics = [#tpu.dimension_semantics<parallel>], iteration_bounds = array<i64: 1>, scalar_prefetch = 0 : i64, scratch_operands = 0 : i64, tpu.core_type = #tpu.core_type<tc>, window_params = [{transform_indices = @transform_0, window_bounds = array<i64: 1, 1>}, {transform_indices = @transform_1, window_bounds = array<i64: 8, 16>}, {pipeline_mode = #tpu.pipeline_mode<synchronous>, transform_indices = @transform_2, window_bounds = array<i64: 16, 128>}, {pipeline_mode = #tpu.pipeline_mode<synchronous>, transform_indices = @transform_3, window_bounds = array<i64: 1, 128>}, {transform_indices = @transform_4, window_bounds = array<i64: 8, 128>}]} {
    %c0 = arith.constant 0 : index
    %c0_0 = arith.constant 0 : index
    %0 = vector.load %arg2[%c0, %c0_0] : memref<8x16xf32, #tpu.memory_space<vmem>>, vector<8x16xf32>
    %c0_1 = arith.constant 0 : index
    %c0_2 = arith.constant 0 : index
    %1 = vector.load %arg3[%c0_1, %c0_2] : memref<16x128xf32, #tpu.memory_space<vmem>>, vector<16x128xf32>
    %cst = arith.constant dense<0.000000e+00> : vector<8x128xf32>
    %2 = tpu.matmul %0, %1, %cst {dimension_numbers = #tpu.dot_dimension_numbers<[1], [0], [0], [1], [0, 0, 1, 1], [], []>} : vector<8x16xf32>, vector<16x128xf32>, vector<8x128xf32> -> vector<8x128xf32>
    %c0_3 = arith.constant 0 : index
    %c0_4 = arith.constant 0 : index
    %3 = vector.load %arg4[%c0_3, %c0_4] : memref<1x128xf32, #tpu.memory_space<vmem>>, vector<1x128xf32>
    %4 = vector.broadcast %3 : vector<1x128xf32> to vector<8x128xf32>
    %5 = arith.addf %2, %4 : vector<8x128xf32>
    %6 = math.cos %5 : vector<8x128xf32>
    %c0_5 = arith.constant 0 : index
    %c0_6 = arith.constant 0 : index
    %7 = memref.load %arg1[%c0_5, %c0_6] : memref<1x1xf32, #tpu.memory_space<smem>>
    %8 = vector.broadcast %7 : f32 to vector<8x128xf32>
    %9 = arith.mulf %6, %8 : vector<8x128xf32>
    %c0_7 = arith.constant 0 : index
    %c0_8 = arith.constant 0 : index
    %10 = vector.load %arg5[%c0_7, %c0_8] : memref<8x128xf32, #tpu.memory_space<vmem>>, vector<8x128xf32>
    tpu.vector_store %arg5[%c0_7, %c0_8], %9 {strides = array<i32>} : memref<8x128xf32, #tpu.memory_space<vmem>>, vector<8x128xf32>,
    return
  }
  func.func @transform_0(%arg0: i32) -> (i32, i32) {
    %c0_i32 = arith.constant 0 : i32
    %c0_i32_0 = arith.constant 0 : i32
    %c0_i32_1 = arith.constant 0 : i32
    return %c0_i32, %c0_i32_0 : i32, i32
  }
  func.func @transform_1(%arg0: i32) -> (i32, i32) {
    %c0_i32 = arith.constant 0 : i32
    %c0_i32_0 = arith.constant 0 : i32
    return %arg0, %c0_i32 : i32, i32
  }
  func.func @transform_2(%arg0: i32) -> (i32, i32) {
    %c0_i32 = arith.constant 0 : i32
    %c0_i32_0 = arith.constant 0 : i32
    %c0_i32_1 = arith.constant 0 : i32
    return %c0_i32, %c0_i32_0 : i32, i32
  }
  func.func @transform_3(%arg0: i32) -> (i32, i32) {
    %c0_i32 = arith.constant 0 : i32
    %c0_i32_0 = arith.constant 0 : i32
    %c0_i32_1 = arith.constant 0 : i32
    return %c0_i32, %c0_i32_0 : i32, i32
  }
  func.func @transform_4(%arg0: i32) -> (i32, i32) {
    %c0_i32 = arith.constant 0 : i32
    %c0_i32_0 = arith.constant 0 : i32
    return %arg0, %c0_i32 : i32, i32
  }
}

module attributes {stable_mosaic.version = 11 : i64} {
  func.func @rff_kernel(%arg0: i32, %arg1: memref<1x1xf32, #tpu.memory_space<smem>>, %arg2: memref<8x16xf32, #tpu.memory_space<vmem>>, %arg3: memref<16x128xf32, #tpu.memory_space<vmem>>, %arg4: memref<1x128xf32, #tpu.memory_space<vmem>>, %arg5: memref<8x128xf32, #tpu.memory_space<vmem>>) attributes {dimension_semantics = [#tpu.dimension_semantics<parallel>], iteration_bounds = array<i64: 1>, scalar_prefetch = 0 : i64, scratch_operands = 0 : i64, tpu.core_type = #tpu.core_type<tc>, window_params = [{transform_indices = @transform_0, window_bounds = array<i64: 1, 1>}, {transform_indices = @transform_1, window_bounds = array<i64: 8, 16>}, {pipeline_mode = #tpu.pipeline_mode<synchronous>, transform_indices = @transform_2, window_bounds = array<i64: 16, 128>}, {pipeline_mode = #tpu.pipeline_mode<synchronous>, transform_indices = @transform_3, window_bounds = array<i64: 1, 128>}, {transform_indices = @transform_4, window_bounds = array<i64: 8, 128>}]} {
    %c0 = arith.constant 0 : index
    %c0_0 = arith.constant 0 : index
    %0 = vector.load %arg2[%c0, %c0_0] : memref<8x16xf32, #tpu.memory_space<vmem>>, vector<8x16xf32>
    %c0_1 = arith.constant 0 : index
    %c0_2 = arith.constant 0 : index
    %1 = vector.load %arg3[%c0_1, %c0_2] : memref<16x128xf32, #tpu.memory_space<vmem>>, vector<16x128xf32>
    %cst = arith.constant dense<0.000000e+00> : vector<8x128xf32>
    %2 = tpu.matmul %0, %1, %cst {dimension_numbers = #tpu.dot_dimension_numbers<[1], [0], [0], [1], [0, 0, 1, 1], [], []>} : vector<8x16xf32>, vector<16x128xf32>, vector<8x128xf32> -> vector<8x128xf32>
    %c0_3 = arith.constant 0 : index
    %c0_4 = arith.constant 0 : index
    %3 = vector.load %arg4[%c0_3, %c0_4] : memref<1x128xf32, #tpu.memory_space<vmem>>, vector<1x128xf32>
    %4 = vector.broadcast %3 : vector<1x128xf32> to vector<8x128xf32>
    %5 = arith.addf %2, %4 : vector<8x128xf32>
    %6 = math.cos %5 : vector<8x128xf32>
    %c0_5 = arith.constant 0 : index
    %c0_6 = arith.constant 0 : index
    %7 = memref.load %arg1[%c0_5, %c0_6] : memref<1x1xf32, #tpu.memory_space<smem>>
    %8 = vector.broadcast %7 : f32 to vector<8x128xf32>
    %9 = arith.mulf %6, %8 : vector<8x128xf32>
    %c0_7 = arith.constant 0 : index
    %c0_8 = arith.constant 0 : index
    %10 = vector.load %arg5[%c0_7, %c0_8] : memref<8x128xf32, #tpu.memory_space<vmem>>, vector<8x128xf32>
    tpu.vector_store %arg5[%c0_7, %c0_8], %9 {strides = array<i32>} : memref<8x128xf32, #tpu.memory_space<vmem>>, vector<8x128xf32>,
    return
  }
  func.func @transform_0(%arg0: i32) -> (i32, i32) {
    %c0_i32 = arith.constant 0 : i32
    %c0_i32_0 = arith.constant 0 : i32
    %c0_i32_1 = arith.constant 0 : i32
    return %c0_i32, %c0_i32_0 : i32, i32
  }
  func.func @transform_1(%arg0: i32) -> (i32, i32) {
    %c0_i32 = arith.constant 0 : i32
    %c0_i32_0 = arith.constant 0 : i32
    return %arg0, %c0_i32 : i32, i32
  }
  func.func @transform_2(%arg0: i32) -> (i32, i32) {
    %c0_i32 = arith.constant 0 : i32
    %c0_i32_0 = arith.constant 0 : i32
    %c0_i32_1 = arith.constant 0 : i32
    return %c0_i32, %c0_i32_0 : i32, i32
  }
  func.func @transform_3(%arg0: i32) -> (i32, i32) {
    %c0_i32 = arith.constant 0 : i32
    %c0_i32_0 = arith.constant 0 : i32
    %c0_i32_1 = arith.constant 0 : i32
    return %c0_i32, %c0_i32_0 : i32, i32
  }
  func.func @transform_4(%arg0: i32) -> (i32, i32) {
    %c0_i32 = arith.constant 0 : i32
    %c0_i32_0 = arith.constant 0 : i32
    return %arg0, %c0_i32 : i32, i32
  }
}

</mosaic_0001>

<bundles_post_ra>
// kernel: _rff_pallas.1
= control target key start
LH: loop header
LB: loop body
LE: loop exit
PB: predicated region body
PF: predicated region fallthrough
CT: control target
= control target key end

     0   :  { %10 = vsyncpa [#allocation4], 0  ;;  %s474_s0 = inlined_call_operand.<no memory space> [shape: f32[1,1], index: 0, kind: input, shape index: {}]   ;;  %s475_s1 = inlined_call_operand.hbm [shape: f32[8,16], index: 1, kind: input, shape index: {}]   ;;  %s476_s2 = inlined_call_operand.hbm [shape: f32[16,128], index: 2, kind: input, shape index: {}]   ;;  %s477_s3 = inlined_call_operand.vmem [shape: f32[1,128], index: 3, kind: input, shape index: {}]   ;;  %s478_s4 = inlined_call_operand.hbm [shape: f32[8,128], index: 4, kind: output, shape index: {}]  }
   0x1   :  { %11 = vsyncpa [#allocation7], 0 }
   0x2   :  { %12 = vsyncpa [#allocation5], 0  ;;  %s365_s15 = smov [#allocation3]   ;;  %s366_s17 = smov [#allocation6]  }
   0x3   :  { %s21_s16 = sshll.u32 %s365_s15, 4  ;;  %s30_s18 = sshll.u32 %s366_s17, 4  ;;  %s22_s16 = int_to_ptr.vmem [resolvable:$true] %s21_s16  ;;  %s404_s18 = int_to_ptr.vmem [resolvable:$true] %s30_s18 }
   0x4   :  { %s293_s21 = scalar_lea.hbm %s475_s1, 128 }
   0x5   :  { %p294_p0 = scmp.ne.s32.totalorder %s475_s1, %s293_s21  ;;  %p297_p1 = scmp.lt.u32.totalorder %s293_s21, %s475_s1 }
   0x7   :  { %p299_p2 = pnand %p297_p1, %p294_p0 }
   0x9   :  { %302 = shalt.err (!%p299_p2)
}
   0xa   :  { %s303_s26 = scalar_lea.vmem %s22_s16, 128  ;;  %p308_p4 = scmp.lt.s32.totalorder %s22_s16, %s22_s16 }
   0xb   :  { %p304_p3 = scmp.ne.s32.totalorder %s22_s16, %s303_s26  ;;  %p309_p5 = scmp.lt.s32.totalorder %s303_s26, %s303_s26 }
   0xd   :  { %p310_p6 = por %p309_p5, %p308_p4 }
   0xf   :  { %p311_p7 = pnand %p310_p6, %p304_p3 }
  0x11   :  { %314 = shalt.err (!%p311_p7)
}
  0x12   :  { %24 = dma.hbm_to_vmem [thread:$0]  %s475_s1, 128, %s22_s16, [#allocation4]  }
  0x13   :  { %s315_s5 = scalar_lea.hbm %s476_s2, 256 }
  0x14   :  { %p316_p8 = scmp.ne.s32.totalorder %s476_s2, %s315_s5  ;;  %p319_p9 = scmp.lt.u32.totalorder %s315_s5, %s476_s2 }
  0x16   :  { %p321_p10 = pnand %p319_p9, %p316_p8 }
  0x18   :  { %324 = shalt.err (!%p321_p10)
}
  0x19   :  { %s325_s10 = scalar_lea.vmem %s404_s18, 256  ;;  %p330_p12 = scmp.lt.s32.totalorder %s404_s18, %s404_s18 }
  0x1a   :  { %p326_p11 = scmp.ne.s32.totalorder %s404_s18, %s325_s10  ;;  %p331_p13 = scmp.lt.s32.totalorder %s325_s10, %s325_s10 }
  0x1c   :  { %p332_p0 = por %p331_p13, %p330_p12 }
  0x1e   :  { %p333_p1 = pnand %p332_p0, %p326_p11 }
  0x20   :  { %336 = shalt.err (!%p333_p1)
}
  0x21   :  { %s367_s1 = smov 128   ;;  %s368_s11 = smov 8  }
  0x22   :  { %36 = dma.hbm_to_vmem [thread:$0]  %s476_s2, 256, %s404_s18, [#allocation7], %s367_s1, %s367_s1, %s368_s11  }
  0x23   :  { %359 = dma.done.wait [#allocation4], 128  }
  0x24   :  { %360 = vsyncadd [#allocation4], 4294967168 }
  0x25   :  { %361 = dma.done.wait [#allocation7], 256  }
  0x26   :  { %362 = vsyncadd [#allocation7], 4294967040  ;;  %v369_v0 = vmov 0.0|0.0   ;;  %vm370_vm0 = vmmov 0   ;;  %v371_v1 = vmov 0.0   ;;  %v46_v2 = vld [vmem:[#allocation6] sm:$0xff] }
  0x27   :  { %268 = vmatprep.subr.bf16.mxu0 %v369_v0  ;;  %265 = vmatprep.mubr.msk.f32.mxu0 %vm370_vm0, %v371_v1  ;;  %v47_v3 = vld [vmem:[#allocation6 + $0x8] sm:$0xff]  ;;  %v45_v5 = vld [vmem:[#allocation3] sm:$0xff]  ;;  %vm55_vm1 = vcmask 130048   ;;  %v372_v20 = vmov 683565275   ;;  %s378_s16 = smov [#allocation8]  }
  0x28   :  { %v269_v4 = vpack.c.bf16 %v47_v3, %v46_v2  ;;  %v252_v6 = vld [vmem:[%s477_s3] ss:$0 sm:$0xff]  ;;  %v373_v22 = vmov 2475754826   ;;  %v374_v25 = vmov 2131351028  }
  0x29   :  { %v375_v28 = vmov 2102212464   ;;  %v376_v31 = vmov 920167782   ;;  %v377_v34 = vmov 1326507024  }
  0x2a   :  { %270 = vmatpush3.bf16.msra.mxu0 %v269_v4  ;;  %s242_s17 = sshll.u32 %s378_s16, 4  ;;  %s243_s17 = int_to_ptr.vmem [resolvable:$true] %s242_s17 }
  0x2b   :  { %s337_s18 = scalar_lea.vmem %s243_s17, 128  ;;  %p342_p3 = scmp.lt.s32.totalorder %s243_s17, %s243_s17 }
  0x2c   :  { %p338_p2 = scmp.ne.s32.totalorder %s243_s17, %s337_s18  ;;  %p343_p4 = scmp.lt.s32.totalorder %s337_s18, %s337_s18 }
  0x2d   :  { %266 = vmatmul.mubr.msk.f32.vlgmr.msra.gmra.mrb[0].mxu0 %vm55_vm1, %v45_v5 }
  0x2e   :  { %p344_p5 = por %p343_p4, %p342_p3 }
  0x30   :  { %p345_p6 = pnand %p344_p5, %p338_p2 }
 0x100   :  { %v125_v7 = vpop.f32.mrb[0].mxu0 }
 0x101   :  { %v438_v8 = vadd.f32 %v252_v6, %v125_v7  ;;  %v267_v9 = vpop.f32.mrb[1].mxu0 }
 0x103   :  { %v132_v10 = vand.u32 2139095040, %v438_v8  ;;  %v129_v14 = vand.u32 2147483647, %v438_v8  ;;  %vm131_vm9 = vcmp.lt.s32.totalorder %v438_v8, 0  ;;  %vm221_vm14 = vweird.f32 %v438_v8 }
 0x105   :  { %v133_v11 = vshrl.u32 %v132_v10, 23  ;;  %v136_v17 = vand.u32 8388607, %v129_v14  ;;  %vm130_vm10 = vcmp.le.f32.partialorder %v129_v14, 0.7853982  ;;  %v233_v14 = vstv %s474_s0 }
 0x107   :  { %v254_v12 = vadd.s32 4294967169, %v133_v11  ;;  %v137_v36 = vor.u32 8388608, %v136_v17 }
 0x109   :  { %v139_v13 = vadd.s32 1, %v254_v12  ;;  %v177_v50 = vshll.u32 %v137_v36, 8 }
 0x10b   :  { %vm140_vm2 = vcmp.gt.s32.totalorder %v139_v13, 0 }
 0x10c   :  { %v141_v15 = vsel %vm140_vm2, %v139_v13, 0 }
 0x10d   :  { %v143_v16 = vand.u32 31, %v141_v15  ;;  %v142_v19 = vshrl.u32 %v141_v15, 5 }
 0x10f   :  { %v144_v18 = vsub.s32 32, %v143_v16  ;;  %v146_v21 = vshll.u32 %v372_v20, %v143_v16  ;;  %v149_v23 = vshll.u32 %v373_v22, %v143_v16  ;;  %v152_v27 = vshll.u32 %v374_v25, %v143_v16 }
 0x110   :  { %v155_v30 = vshll.u32 %v375_v28, %v143_v16  ;;  %v158_v33 = vshll.u32 %v376_v31, %v143_v16  ;;  %vm161_vm3 = vcmp.lt.s32.totalorder %v142_v19, 1  ;;  %vm164_vm4 = vcmp.lt.s32.totalorder %v142_v19, 4 }
 0x111   :  { %v147_v24 = vshrl.u32 %v373_v22, %v144_v18  ;;  %v150_v26 = vshrl.u32 %v374_v25, %v144_v18  ;;  %v153_v29 = vshrl.u32 %v375_v28, %v144_v18  ;;  %v156_v32 = vshrl.u32 %v376_v31, %v144_v18 }
 0x112   :  { %v159_v35 = vshrl.u32 %v377_v34, %v144_v18  ;;  %v145_v45 = vshrl.u32 %v372_v20, %v144_v18  ;;  %vm163_vm5 = vcmp.lt.s32.totalorder %v142_v19, 3  ;;  %vm162_vm6 = vcmp.lt.s32.totalorder %v142_v19, 2 }
 0x113   :  { %v148_v37 = vor.u32 %v147_v24, %v146_v21  ;;  %v151_v38 = vor.u32 %v150_v26, %v149_v23  ;;  %v154_v39 = vor.u32 %v153_v29, %v152_v27  ;;  %v157_v40 = vor.u32 %v156_v32, %v155_v30 }
 0x114   :  { %v160_v41 = vor.u32 %v159_v35, %v158_v33 }
 0x115   :  { %v166_v42 = vsel %vm164_vm4, %v154_v39, 2102212464  ;;  %v169_v43 = vsel %vm161_vm3, %v148_v37, %v151_v38  ;;  %v173_v44 = vsel %vm161_vm3, %v151_v38, %v154_v39  ;;  %v170_v46 = vsel %vm164_vm4, %v157_v40, 920167782 }
 0x116   :  { %v174_v47 = vsel %vm164_vm4, %v160_v41, 1326507024  ;;  %v171_v48 = vsel %vm163_vm5, %v154_v39, %v170_v46  ;;  %v165_v51 = vsel %vm161_vm3, %v145_v45, %v148_v37  ;;  %v167_v52 = vsel %vm163_vm5, %v151_v38, %v166_v42 }
 0x117   :  { %v175_v49 = vsel %vm163_vm5, %v157_v40, %v174_v47  ;;  %v172_v53 = vsel %vm162_vm6, %v169_v43, %v171_v48  ;;  %v168_v59 = vsel %vm162_vm6, %v165_v51, %v167_v52 }
 0x118   :  { %v176_v54 = vsel %vm162_vm6, %v173_v44, %v175_v49  ;;  %v447_v57 = vmul.u32.u64.low %v177_v50, %v172_v53  ;;  %v448_v58 = vmul.u32.u64.high %v177_v50, %v172_v53, %v447_v57  ;;  %v184_v61 = vmul.u32 %v177_v50, %v168_v59 }
 0x119   :  { %v444_v55 = vmul.u32.u64.low %v177_v50, %v176_v54  ;;  %v445_v56 = vmul.u32.u64.high %v177_v50, %v176_v54, %v444_v55 }
 0x11a   :  { %v187_v60 = vadd.s32 1, %v448_v58 }
 0x11b   :  { %vm186_vm7 = vc.u32 %v445_v56, %v447_v57  ;;  %v185_v10 = vadd.s32 %v447_v57, %v445_v56 }
 0x11c   :  { %v188_v62 = vsel %vm186_vm7, %v187_v60, %v448_v58 }
 0x11d   :  { %v189_v63 = vadd.s32 %v188_v62, %v184_v61 }
 0x11f   :  { %v190_v0 = vadd.s32 536870912, %v189_v63 }
 0x121   :  { %v191_v1 = vshrl.u32 %v190_v0, 30 }
 0x123   :  { %v192_v2 = vshll.u32 %v191_v1, 30  ;;  %v215_v25 = vsub.s32 4, %v191_v1 }
 0x125   :  { %v193_v3 = vsub.s32 %v189_v63, %v192_v2  ;;  %v216_v27 = vsel %vm131_vm9, %v215_v25, %v191_v1 }
 0x126   :  { %v218_v28 = vsel %vm130_vm10, 0, %v216_v27 }
 0x127   :  { %v195_v4 = vsub.s32 0, %v193_v3  ;;  %v222_v29 = vand.u32 3, %v218_v28 }
 0x129   :  { %v255_v5 = vmin.u32 %v195_v4, %v193_v3  ;;  %vm227_vm11 = vcmp.eq.s32.totalorder %v222_v29, 2  ;;  %vm224_vm12 = vcmp.eq.s32.totalorder %v222_v29, 0  ;;  %vm223_vm13 = vcmp.lt.s32.totalorder %v222_v29, 2 }
 0x12b   :  { %v197_v6 = vclz %v255_v5 }
 0x12d   :  { %v256_v7 = vadd.s32 4294967294, %v197_v6 }
 0x12f   :  { %vm257_vm8 = vcmp.lt.s32.totalorder %v256_v7, 0 }
 0x130   :  { %v200_v9 = vsel %vm257_vm8, 0, %v256_v7 }
 0x131   :  { %v201_v11 = vsub.s32 32, %v200_v9  ;;  %v205_v12 = vsub.s32 4294967266, %v200_v9  ;;  %v202_v13 = vshll.u32 %v193_v3, %v200_v9 }
 0x133   :  { %v203_v15 = vshrl.u32 %v185_v10, %v201_v11  ;;  %v206_v16 = vadd.s32 127, %v205_v12 }
 0x135   :  { %v204_v17 = vor.u32 %v203_v15, %v202_v13  ;;  %v207_v18 = vshll.u32 %v206_v16, 23 }
 0x137   :  { %v208_v19 = vor.u32 4788187, %v207_v18  ;;  %v211_v21 = vcvt.s32.f32 %v204_v17 }
 0x139   :  { %v209_v20 = vand.u32 2147483647, %v208_v19 }
 0x13b   :  { %v212_v22 = vmul.f32 %v211_v21, %v209_v20 }
 0x13d   :  { %v213_v23 = vxor.u32 2147483648, %v212_v22 }
 0x13f   :  { %v214_v24 = vsel %vm131_vm9, %v213_v23, %v212_v22 }
 0x140   :  { %v217_v26 = vsel %vm130_vm10, %v438_v8, %v214_v24 }
 0x141   :  { %289 = vcosq.f32 %v217_v26 }
 0x142   :  { %291 = vsinq.f32 %v217_v26 }
 0x14b   :  { %v290_v30 = vpop.eup %289 }
 0x14c   :  { %v292_v31 = vpop.eup %291  ;;  %v228_v32 = vxor.u32 2147483648, %v290_v30 }
 0x14d   :  { %v225_v33 = vxor.u32 2147483648, %v292_v31 }
 0x14e   :  { %v229_v34 = vsel %vm227_vm11, %v228_v32, %v292_v31 }
 0x14f   :  { %v226_v35 = vsel %vm224_vm12, %v290_v30, %v225_v33 }
 0x150   :  { %v230_v36 = vsel %vm223_vm13, %v226_v35, %v229_v34 }
 0x151   :  { %v231_v37 = vsel %vm221_vm14, nan, %v230_v36 }
 0x152   :  { %v234_v38 = vmul.f32 %v233_v14, %v231_v37 }
 0x154   :  { %235 = vst [vmem:[#allocation8] sm:$0xff] %v234_v38 }
 0x155   :  { %348 = shalt.err (!%p345_p6)
}
 0x156   :  { %s349_s0 = scalar_lea.hbm %s478_s4, 128 }
 0x157   :  { %p350_p7 = scmp.ne.s32.totalorder %s478_s4, %s349_s0  ;;  %p353_p8 = scmp.lt.u32.totalorder %s349_s0, %s478_s4 }
 0x159   :  { %p355_p9 = pnand %p353_p8, %p350_p7 }
 0x15b   :  { %358 = shalt.err (!%p355_p9)
}
 0x15c   :  { %245 = dma.vmem_to_hbm [thread:$0]  %s243_s17, 128, %s478_s4, [#allocation5]  }
 0x15d   :  { %363 = dma.done.wait [#allocation5], 128  }
 0x15e   :  { %364 = vsyncadd [#allocation5], 4294967168 }
 0x15f   :  { %249 = vsyncpa [#allocation4], 1 }
 0x160   :  { %250 = vsyncpa [#allocation7], 1 }
 0x161   :  { %251 = vsyncpa [#allocation5], 1 }

// kernel: _rff_pallas.1
= control target key start
LH: loop header
LB: loop body
LE: loop exit
PB: predicated region body
PF: predicated region fallthrough
CT: control target
= control target key end

     0   :  { %10 = vsyncpa [#allocation4], 0  ;;  %s474_s0 = inlined_call_operand.<no memory space> [shape: f32[1,1], index: 0, kind: input, shape index: {}]   ;;  %s475_s1 = inlined_call_operand.hbm [shape: f32[8,16], index: 1, kind: input, shape index: {}]   ;;  %s476_s2 = inlined_call_operand.hbm [shape: f32[16,128], index: 2, kind: input, shape index: {}]   ;;  %s477_s3 = inlined_call_operand.vmem [shape: f32[1,128], index: 3, kind: input, shape index: {}]   ;;  %s478_s4 = inlined_call_operand.hbm [shape: f32[8,128], index: 4, kind: output, shape index: {}]  }
   0x1   :  { %11 = vsyncpa [#allocation7], 0 }
   0x2   :  { %12 = vsyncpa [#allocation5], 0  ;;  %s365_s15 = smov [#allocation3]   ;;  %s366_s17 = smov [#allocation6]  }
   0x3   :  { %s21_s16 = sshll.u32 %s365_s15, 4  ;;  %s30_s18 = sshll.u32 %s366_s17, 4  ;;  %s22_s16 = int_to_ptr.vmem [resolvable:$true] %s21_s16  ;;  %s404_s18 = int_to_ptr.vmem [resolvable:$true] %s30_s18 }
   0x4   :  { %s293_s21 = scalar_lea.hbm %s475_s1, 128 }
   0x5   :  { %p294_p0 = scmp.ne.s32.totalorder %s475_s1, %s293_s21  ;;  %p297_p1 = scmp.lt.u32.totalorder %s293_s21, %s475_s1 }
   0x7   :  { %p299_p2 = pnand %p297_p1, %p294_p0 }
   0x9   :  { %302 = shalt.err (!%p299_p2)
}
   0xa   :  { %s303_s26 = scalar_lea.vmem %s22_s16, 128  ;;  %p308_p4 = scmp.lt.s32.totalorder %s22_s16, %s22_s16 }
   0xb   :  { %p304_p3 = scmp.ne.s32.totalorder %s22_s16, %s303_s26  ;;  %p309_p5 = scmp.lt.s32.totalorder %s303_s26, %s303_s26 }
   0xd   :  { %p310_p6 = por %p309_p5, %p308_p4 }
   0xf   :  { %p311_p7 = pnand %p310_p6, %p304_p3 }
  0x11   :  { %314 = shalt.err (!%p311_p7)
}
  0x12   :  { %24 = dma.hbm_to_vmem [thread:$0]  %s475_s1, 128, %s22_s16, [#allocation4]  }
  0x13   :  { %s315_s5 = scalar_lea.hbm %s476_s2, 256 }
  0x14   :  { %p316_p8 = scmp.ne.s32.totalorder %s476_s2, %s315_s5  ;;  %p319_p9 = scmp.lt.u32.totalorder %s315_s5, %s476_s2 }
  0x16   :  { %p321_p10 = pnand %p319_p9, %p316_p8 }
  0x18   :  { %324 = shalt.err (!%p321_p10)
}
  0x19   :  { %s325_s10 = scalar_lea.vmem %s404_s18, 256  ;;  %p330_p12 = scmp.lt.s32.totalorder %s404_s18, %s404_s18 }
  0x1a   :  { %p326_p11 = scmp.ne.s32.totalorder %s404_s18, %s325_s10  ;;  %p331_p13 = scmp.lt.s32.totalorder %s325_s10, %s325_s10 }
  0x1c   :  { %p332_p0 = por %p331_p13, %p330_p12 }
  0x1e   :  { %p333_p1 = pnand %p332_p0, %p326_p11 }
  0x20   :  { %336 = shalt.err (!%p333_p1)
}
  0x21   :  { %s367_s1 = smov 128   ;;  %s368_s11 = smov 8  }
  0x22   :  { %36 = dma.hbm_to_vmem [thread:$0]  %s476_s2, 256, %s404_s18, [#allocation7], %s367_s1, %s367_s1, %s368_s11  }
  0x23   :  { %359 = dma.done.wait [#allocation4], 128  }
  0x24   :  { %360 = vsyncadd [#allocation4], 4294967168 }
  0x25   :  { %361 = dma.done.wait [#allocation7], 256  }
  0x26   :  { %362 = vsyncadd [#allocation7], 4294967040  ;;  %v369_v0 = vmov 0.0|0.0   ;;  %vm370_vm0 = vmmov 0   ;;  %v371_v1 = vmov 0.0   ;;  %v46_v2 = vld [vmem:[#allocation6] sm:$0xff] }
  0x27   :  { %268 = vmatprep.subr.bf16.mxu0 %v369_v0  ;;  %265 = vmatprep.mubr.msk.f32.mxu0 %vm370_vm0, %v371_v1  ;;  %v47_v3 = vld [vmem:[#allocation6 + $0x8] sm:$0xff]  ;;  %v45_v5 = vld [vmem:[#allocation3] sm:$0xff]  ;;  %vm55_vm1 = vcmask 130048   ;;  %v372_v20 = vmov 683565275   ;;  %s378_s16 = smov [#allocation8]  }
  0x28   :  { %v269_v4 = vpack.c.bf16 %v47_v3, %v46_v2  ;;  %v252_v6 = vld [vmem:[%s477_s3] ss:$0 sm:$0xff]  ;;  %v373_v22 = vmov 2475754826   ;;  %v374_v25 = vmov 2131351028  }
  0x29   :  { %v375_v28 = vmov 2102212464   ;;  %v376_v31 = vmov 920167782   ;;  %v377_v34 = vmov 1326507024  }
  0x2a   :  { %270 = vmatpush3.bf16.msra.mxu0 %v269_v4  ;;  %s242_s17 = sshll.u32 %s378_s16, 4  ;;  %s243_s17 = int_to_ptr.vmem [resolvable:$true] %s242_s17 }
  0x2b   :  { %s337_s18 = scalar_lea.vmem %s243_s17, 128  ;;  %p342_p3 = scmp.lt.s32.totalorder %s243_s17, %s243_s17 }
  0x2c   :  { %p338_p2 = scmp.ne.s32.totalorder %s243_s17, %s337_s18  ;;  %p343_p4 = scmp.lt.s32.totalorder %s337_s18, %s337_s18 }
  0x2d   :  { %266 = vmatmul.mubr.msk.f32.vlgmr.msra.gmra.mrb[0].mxu0 %vm55_vm1, %v45_v5 }
  0x2e   :  { %p344_p5 = por %p343_p4, %p342_p3 }
  0x30   :  { %p345_p6 = pnand %p344_p5, %p338_p2 }
 0x100   :  { %v125_v7 = vpop.f32.mrb[0].mxu0 }
 0x101   :  { %v438_v8 = vadd.f32 %v252_v6, %v125_v7  ;;  %v267_v9 = vpop.f32.mrb[1].mxu0 }
 0x103   :  { %v132_v10 = vand.u32 2139095040, %v438_v8  ;;  %v129_v14 = vand.u32 2147483647, %v438_v8  ;;  %vm131_vm9 = vcmp.lt.s32.totalorder %v438_v8, 0  ;;  %vm221_vm14 = vweird.f32 %v438_v8 }
 0x105   :  { %v133_v11 = vshrl.u32 %v132_v10, 23  ;;  %v136_v17 = vand.u32 8388607, %v129_v14  ;;  %vm130_vm10 = vcmp.le.f32.partialorder %v129_v14, 0.7853982  ;;  %v233_v14 = vstv %s474_s0 }
 0x107   :  { %v254_v12 = vadd.s32 4294967169, %v133_v11  ;;  %v137_v36 = vor.u32 8388608, %v136_v17 }
 0x109   :  { %v139_v13 = vadd.s32 1, %v254_v12  ;;  %v177_v50 = vshll.u32 %v137_v36, 8 }
 0x10b   :  { %vm140_vm2 = vcmp.gt.s32.totalorder %v139_v13, 0 }
 0x10c   :  { %v141_v15 = vsel %vm140_vm2, %v139_v13, 0 }
 0x10d   :  { %v143_v16 = vand.u32 31, %v141_v15  ;;  %v142_v19 = vshrl.u32 %v141_v15, 5 }
 0x10f   :  { %v144_v18 = vsub.s32 32, %v143_v16  ;;  %v146_v21 = vshll.u32 %v372_v20, %v143_v16  ;;  %v149_v23 = vshll.u32 %v373_v22, %v143_v16  ;;  %v152_v27 = vshll.u32 %v374_v25, %v143_v16 }
 0x110   :  { %v155_v30 = vshll.u32 %v375_v28, %v143_v16  ;;  %v158_v33 = vshll.u32 %v376_v31, %v143_v16  ;;  %vm161_vm3 = vcmp.lt.s32.totalorder %v142_v19, 1  ;;  %vm164_vm4 = vcmp.lt.s32.totalorder %v142_v19, 4 }
 0x111   :  { %v147_v24 = vshrl.u32 %v373_v22, %v144_v18  ;;  %v150_v26 = vshrl.u32 %v374_v25, %v144_v18  ;;  %v153_v29 = vshrl.u32 %v375_v28, %v144_v18  ;;  %v156_v32 = vshrl.u32 %v376_v31, %v144_v18 }
 0x112   :  { %v159_v35 = vshrl.u32 %v377_v34, %v144_v18  ;;  %v145_v45 = vshrl.u32 %v372_v20, %v144_v18  ;;  %vm163_vm5 = vcmp.lt.s32.totalorder %v142_v19, 3  ;;  %vm162_vm6 = vcmp.lt.s32.totalorder %v142_v19, 2 }
 0x113   :  { %v148_v37 = vor.u32 %v147_v24, %v146_v21  ;;  %v151_v38 = vor.u32 %v150_v26, %v149_v23  ;;  %v154_v39 = vor.u32 %v153_v29, %v152_v27  ;;  %v157_v40 = vor.u32 %v156_v32, %v155_v30 }
 0x114   :  { %v160_v41 = vor.u32 %v159_v35, %v158_v33 }
 0x115   :  { %v166_v42 = vsel %vm164_vm4, %v154_v39, 2102212464  ;;  %v169_v43 = vsel %vm161_vm3, %v148_v37, %v151_v38  ;;  %v173_v44 = vsel %vm161_vm3, %v151_v38, %v154_v39  ;;  %v170_v46 = vsel %vm164_vm4, %v157_v40, 920167782 }
 0x116   :  { %v174_v47 = vsel %vm164_vm4, %v160_v41, 1326507024  ;;  %v171_v48 = vsel %vm163_vm5, %v154_v39, %v170_v46  ;;  %v165_v51 = vsel %vm161_vm3, %v145_v45, %v148_v37  ;;  %v167_v52 = vsel %vm163_vm5, %v151_v38, %v166_v42 }
 0x117   :  { %v175_v49 = vsel %vm163_vm5, %v157_v40, %v174_v47  ;;  %v172_v53 = vsel %vm162_vm6, %v169_v43, %v171_v48  ;;  %v168_v59 = vsel %vm162_vm6, %v165_v51, %v167_v52 }
 0x118   :  { %v176_v54 = vsel %vm162_vm6, %v173_v44, %v175_v49  ;;  %v447_v57 = vmul.u32.u64.low %v177_v50, %v172_v53  ;;  %v448_v58 = vmul.u32.u64.high %v177_v50, %v172_v53, %v447_v57  ;;  %v184_v61 = vmul.u32 %v177_v50, %v168_v59 }
 0x119   :  { %v444_v55 = vmul.u32.u64.low %v177_v50, %v176_v54  ;;  %v445_v56 = vmul.u32.u64.high %v177_v50, %v176_v54, %v444_v55 }
 0x11a   :  { %v187_v60 = vadd.s32 1, %v448_v58 }
 0x11b   :  { %vm186_vm7 = vc.u32 %v445_v56, %v447_v57  ;;  %v185_v10 = vadd.s32 %v447_v57, %v445_v56 }
 0x11c   :  { %v188_v62 = vsel %vm186_vm7, %v187_v60, %v448_v58 }
 0x11d   :  { %v189_v63 = vadd.s32 %v188_v62, %v184_v61 }
 0x11f   :  { %v190_v0 = vadd.s32 536870912, %v189_v63 }
 0x121   :  { %v191_v1 = vshrl.u32 %v190_v0, 30 }
 0x123   :  { %v192_v2 = vshll.u32 %v191_v1, 30  ;;  %v215_v25 = vsub.s32 4, %v191_v1 }
 0x125   :  { %v193_v3 = vsub.s32 %v189_v63, %v192_v2  ;;  %v216_v27 = vsel %vm131_vm9, %v215_v25, %v191_v1 }
 0x126   :  { %v218_v28 = vsel %vm130_vm10, 0, %v216_v27 }
 0x127   :  { %v195_v4 = vsub.s32 0, %v193_v3  ;;  %v222_v29 = vand.u32 3, %v218_v28 }
 0x129   :  { %v255_v5 = vmin.u32 %v195_v4, %v193_v3  ;;  %vm227_vm11 = vcmp.eq.s32.totalorder %v222_v29, 2  ;;  %vm224_vm12 = vcmp.eq.s32.totalorder %v222_v29, 0  ;;  %vm223_vm13 = vcmp.lt.s32.totalorder %v222_v29, 2 }
 0x12b   :  { %v197_v6 = vclz %v255_v5 }
 0x12d   :  { %v256_v7 = vadd.s32 4294967294, %v197_v6 }
 0x12f   :  { %vm257_vm8 = vcmp.lt.s32.totalorder %v256_v7, 0 }
 0x130   :  { %v200_v9 = vsel %vm257_vm8, 0, %v256_v7 }
 0x131   :  { %v201_v11 = vsub.s32 32, %v200_v9  ;;  %v205_v12 = vsub.s32 4294967266, %v200_v9  ;;  %v202_v13 = vshll.u32 %v193_v3, %v200_v9 }
 0x133   :  { %v203_v15 = vshrl.u32 %v185_v10, %v201_v11  ;;  %v206_v16 = vadd.s32 127, %v205_v12 }
 0x135   :  { %v204_v17 = vor.u32 %v203_v15, %v202_v13  ;;  %v207_v18 = vshll.u32 %v206_v16, 23 }
 0x137   :  { %v208_v19 = vor.u32 4788187, %v207_v18  ;;  %v211_v21 = vcvt.s32.f32 %v204_v17 }
 0x139   :  { %v209_v20 = vand.u32 2147483647, %v208_v19 }
 0x13b   :  { %v212_v22 = vmul.f32 %v211_v21, %v209_v20 }
 0x13d   :  { %v213_v23 = vxor.u32 2147483648, %v212_v22 }
 0x13f   :  { %v214_v24 = vsel %vm131_vm9, %v213_v23, %v212_v22 }
 0x140   :  { %v217_v26 = vsel %vm130_vm10, %v438_v8, %v214_v24 }
 0x141   :  { %289 = vcosq.f32 %v217_v26 }
 0x142   :  { %291 = vsinq.f32 %v217_v26 }
 0x14b   :  { %v290_v30 = vpop.eup %289 }
 0x14c   :  { %v292_v31 = vpop.eup %291  ;;  %v228_v32 = vxor.u32 2147483648, %v290_v30 }
 0x14d   :  { %v225_v33 = vxor.u32 2147483648, %v292_v31 }
 0x14e   :  { %v229_v34 = vsel %vm227_vm11, %v228_v32, %v292_v31 }
 0x14f   :  { %v226_v35 = vsel %vm224_vm12, %v290_v30, %v225_v33 }
 0x150   :  { %v230_v36 = vsel %vm223_vm13, %v226_v35, %v229_v34 }
 0x151   :  { %v231_v37 = vsel %vm221_vm14, nan, %v230_v36 }
 0x152   :  { %v234_v38 = vmul.f32 %v233_v14, %v231_v37 }
 0x154   :  { %235 = vst [vmem:[#allocation8] sm:$0xff] %v234_v38 }
 0x155   :  { %348 = shalt.err (!%p345_p6)
}
 0x156   :  { %s349_s0 = scalar_lea.hbm %s478_s4, 128 }
 0x157   :  { %p350_p7 = scmp.ne.s32.totalorder %s478_s4, %s349_s0  ;;  %p353_p8 = scmp.lt.u32.totalorder %s349_s0, %s478_s4 }
 0x159   :  { %p355_p9 = pnand %p353_p8, %p350_p7 }
 0x15b   :  { %358 = shalt.err (!%p355_p9)
}
 0x15c   :  { %245 = dma.vmem_to_hbm [thread:$0]  %s243_s17, 128, %s478_s4, [#allocation5]  }
 0x15d   :  { %363 = dma.done.wait [#allocation5], 128  }
 0x15e   :  { %364 = vsyncadd [#allocation5], 4294967168 }
 0x15f   :  { %249 = vsyncpa [#allocation4], 1 }
 0x160   :  { %250 = vsyncpa [#allocation7], 1 }
 0x161   :  { %251 = vsyncpa [#allocation5], 1 }

</bundles_post_ra>
